<compile_context>
chip_gen: v7x
topology: tpu7x:2x2x1
jax: 0.10.0
libtpu: 0.0.40
codegen_flags: <defaults>
</compile_context>

<pallas_src>
import math

import jax
import jax.numpy as jnp
from jax.experimental import pallas as pl
from jax.experimental.pallas import tpu as pltpu


def _round_up(x, m):
    return ((x + m - 1) // m) * m


def _ffn_kernel(x_ref, w1_ref, b1_ref, w2_ref, b2_ref, o_ref, acc_ref):
    # x_ref:  (tm, d_model)
    # w1_ref: (d_model, tk),  b1_ref: (1, tk)       [k-th d_ff slice]
    # w2_ref: (tk, d_model),  b2_ref: (1, d_model)
    # o_ref:  (tm, d_model)
    # acc_ref: (tm, d_model) f32 accumulator, resident across the k axis.
    k = pl.program_id(1)

    @pl.when(k == 0)
    def _init():
        acc_ref[...] = jnp.zeros_like(acc_ref)

    x = x_ref[...]
    # First matmul on the MXU, f32 accumulation; bias + GELU in f32.
    h = jnp.dot(x, w1_ref[...], preferred_element_type=jnp.float32) + b1_ref[...]
    # Exact GELU (erf form), matching F.gelu's default.
    h = 0.5 * h * (1.0 + jax.lax.erf(h * (1.0 / math.sqrt(2.0))))
    # Dropout: inference mode -> identity.
    acc_ref[...] += jnp.dot(h.astype(w2_ref.dtype), w2_ref[...],
                            preferred_element_type=jnp.float32)

    @pl.when(k == pl.num_programs(1) - 1)
    def _finalize():
        # b2 added exactly once, in the finalize step.
        o_ref[...] = (acc_ref[...] + b2_ref[...]).astype(o_ref.dtype)


def feed_forward(x, w1, b1, w2, b2, *, tm=256, tk=512, matmul_dtype=None):
    """x: (batch, seq, d_model) -> (batch, seq, d_model).

    tm: row tile (MXU-filling; 256 default, multiple of 8).
    tk: d_ff slice streamed per reduction step (multiple of 128, or full d_ff).
    matmul_dtype: optionally cast MXU operands (e.g. jnp.bfloat16 on v6e/v7x);
                  None keeps the original dtype / numerics.
    """
    B, S, d_model = x.shape
    d_ff = w1.shape[1]
    out_dtype = x.dtype
    M = B * S

    x2 = x.reshape(M, d_model)

    # --- row tile selection (clamp for small problems, pad rows to tile) ---
    tm_eff = _round_up(min(tm, _round_up(M, 8)), 8)
    m_pad = _round_up(M, tm_eff)
    if m_pad != M:
        x2 = jnp.pad(x2, ((0, m_pad - M), (0, 0)))

    # --- d_ff slice selection (multiple of 128, or the full d_ff); pad d_ff ---
    if d_ff <= tk:
        tk_eff = d_ff
    else:
        tk_eff = _round_up(min(tk, d_ff), 128)
    dff_pad = _round_up(d_ff, tk_eff)
    if dff_pad != d_ff:
        # Zero-padded W1 columns / W2 rows contribute exactly zero.
        w1 = jnp.pad(w1, ((0, 0), (0, dff_pad - d_ff)))
        b1 = jnp.pad(b1, ((0, dff_pad - d_ff),))
        w2 = jnp.pad(w2, ((0, dff_pad - d_ff), (0, 0)))

    b1_2 = b1.reshape(1, dff_pad).astype(jnp.float32)
    b2_2 = b2.reshape(1, d_model).astype(jnp.float32)

    if matmul_dtype is not None:
        x2 = x2.astype(matmul_dtype)
        w1 = w1.astype(matmul_dtype)
        w2 = w2.astype(matmul_dtype)

    grid = (m_pad // tm_eff, dff_pad // tk_eff)

    # --- explicit VMEM budget: double-buffered tiles + f32 accumulator ---
    in_bytes = jnp.dtype(x2.dtype).itemsize
    out_bytes = jnp.dtype(out_dtype).itemsize
    vmem_bytes = 2 * (
        tm_eff * d_model * in_bytes          # x row tile
        + d_model * tk_eff * in_bytes        # W1 slice
        + tk_eff * d_model * in_bytes        # W2 slice
        + tk_eff * 4 + d_model * 4           # bias slices (f32)
        + tm_eff * d_model * out_bytes       # output tile
    ) + tm_eff * d_model * 4                 # accumulator scratch
    # Headroom above the estimate, above the 16/32 MiB scoped defaults, but
    # capped at 64 MiB so the same config is valid on v7x.
    vmem_limit = int(min(max(2 * vmem_bytes, 32 * 1024 * 1024), 64 * 1024 * 1024))

    out2 = pl.pallas_call(
        _ffn_kernel,
        out_shape=jax.ShapeDtypeStruct((m_pad, d_model), out_dtype),
        grid_spec=pltpu.PrefetchScalarGridSpec(
            num_scalar_prefetch=0,
            grid=grid,
            in_specs=[
                pl.BlockSpec((tm_eff, d_model), lambda i, k: (i, 0)),   # x rows
                pl.BlockSpec((d_model, tk_eff), lambda i, k: (0, k)),   # W1 slice
                pl.BlockSpec((1, tk_eff), lambda i, k: (0, k)),         # b1 slice
                pl.BlockSpec((tk_eff, d_model), lambda i, k: (k, 0)),   # W2 slice
                pl.BlockSpec((1, d_model), lambda i, k: (0, 0)),        # b2
            ],
            # Lane-dense (tm, d_model) output slab; same block across k
            # (accumulator-resident, written in the finalize step).
            out_specs=pl.BlockSpec((tm_eff, d_model), lambda i, k: (i, 0)),
            scratch_shapes=[pltpu.VMEM((tm_eff, d_model), jnp.float32)],
        ),
        compiler_params=pltpu.CompilerParams(
            dimension_semantics=("parallel", "arbitrary"),
            vmem_limit_bytes=vmem_limit),
    )(x2, w1, b1_2, w2, b2_2)

    return out2[:M].reshape(B, S, d_model)


def _init_params(key, d_model, d_ff):
    """Deterministic init mimicking nn.Linear's uniform(-1/sqrt(fan_in), 1/sqrt(fan_in))."""
    k1, k2, k3, k4 = jax.random.split(key, 4)
    lim1 = 1.0 / math.sqrt(d_model)
    lim2 = 1.0 / math.sqrt(d_ff)
    w1 = jax.random.uniform(k1, (d_model, d_ff), jnp.float32, -lim1, lim1)
    b1 = jax.random.uniform(k2, (d_ff,), jnp.float32, -lim1, lim1)
    w2 = jax.random.uniform(k3, (d_ff, d_model), jnp.float32, -lim2, lim2)
    b2 = jax.random.uniform(k4, (d_model,), jnp.float32, -lim2, lim2)
    return w1, b1, w2, b2


def _reference(x, w1, b1, w2, b2):
    h = jax.nn.gelu(x @ w1 + b1, approximate=False)
    return h @ w2 + b2


if __name__ == "__main__":
    key = jax.random.PRNGKey(0)
    kx, kp, kx2, kp2 = jax.random.split(key, 4)

    # Small shapes consistent with the module (single-step reduction path).
    batch, seq, d_model, d_ff = 2, 8, 32, 64
    x = jax.random.normal(kx, (batch, seq, d_model), jnp.float32)
    w1, b1, w2, b2 = _init_params(kp, d_model, d_ff)

    out = feed_forward(x, w1, b1, w2, b2)
    out = jax.block_until_ready(out)
    ref = _reference(x, w1, b1, w2, b2)
    assert out.shape == (batch, seq, d_model)
    assert jnp.allclose(out, ref, atol=1e-5, rtol=1e-5), "mismatch vs reference (small)"

    # Slightly larger case exercising the multi-tile row axis, the streamed
    # d_ff reduction axis (grid=(2,2)) and the VMEM accumulator / finalize.
    batch2, seq2, d_model2, d_ff2 = 2, 64, 128, 256
    x_b = jax.random.normal(kx2, (batch2, seq2, d_model2), jnp.float32)
    w1b, b1b, w2b, b2b = _init_params(kp2, d_model2, d_ff2)

    out_b = feed_forward(x_b, w1b, b1b, w2b, b2b, tm=64, tk=128)
    out_b = jax.block_until_ready(out_b)
    ref_b = _reference(x_b, w1b, b1b, w2b, b2b)
    assert out_b.shape == (batch2, seq2, d_model2)
    assert jnp.allclose(out_b, ref_b, atol=1e-4, rtol=1e-4), "mismatch vs reference (tiled)"

    print("KERNEL_OK")
</pallas_src>

<mosaic_0001>
module attributes {stable_mosaic.version = 11 : i64} {
  func.func @_ffn_kernel(%arg0: i32, %arg1: i32, %arg2: memref<16x32xf32, #tpu.memory_space<vmem>>, %arg3: memref<32x64xf32, #tpu.memory_space<vmem>>, %arg4: memref<1x64xf32, #tpu.memory_space<vmem>>, %arg5: memref<64x32xf32, #tpu.memory_space<vmem>>, %arg6: memref<1x32xf32, #tpu.memory_space<vmem>>, %arg7: memref<16x32xf32, #tpu.memory_space<vmem>>, %arg8: memref<16x32xf32, #tpu.memory_space<vmem>>) attributes {dimension_semantics = [#tpu.dimension_semantics<parallel>, #tpu.dimension_semantics<arbitrary>], iteration_bounds = array<i64: 1, 1>, scalar_prefetch = 0 : i64, scratch_operands = 1 : i64, tpu.core_type = #tpu.core_type<tc>, window_params = [{transform_indices = @transform_0, window_bounds = array<i64: 16, 32>}, {transform_indices = @transform_1, window_bounds = array<i64: 32, 64>}, {transform_indices = @transform_2, window_bounds = array<i64: 1, 64>}, {transform_indices = @transform_3, window_bounds = array<i64: 64, 32>}, {pipeline_mode = #tpu.pipeline_mode<synchronous>, transform_indices = @transform_4, window_bounds = array<i64: 1, 32>}, {transform_indices = @transform_5, window_bounds = array<i64: 16, 32>}]} {
    %c0_i32 = arith.constant 0 : i32
    %0 = arith.cmpi eq, %arg1, %c0_i32 : i32
    %1 = arith.extui %0 : i1 to i32
    %c0_i32_0 = arith.constant 0 : i32
    %2 = arith.cmpi ne, %1, %c0_i32_0 : i32
    scf.if %2 {
      %cst_18 = arith.constant 0.000000e+00 : f32
      %25 = vector.broadcast %cst_18 : f32 to vector<16x32xf32>
      %c0_19 = arith.constant 0 : index
      %c0_20 = arith.constant 0 : index
      %26 = vector.load %arg8[%c0_19, %c0_20] : memref<16x32xf32, #tpu.memory_space<vmem>>, vector<16x32xf32>
      tpu.vector_store %arg8[%c0_19, %c0_20], %25 {strides = array<i32>} : memref<16x32xf32, #tpu.memory_space<vmem>>, vector<16x32xf32>,
    } else {
    }
    %c0 = arith.constant 0 : index
    %c0_1 = arith.constant 0 : index
    %3 = vector.load %arg2[%c0, %c0_1] : memref<16x32xf32, #tpu.memory_space<vmem>>, vector<16x32xf32>
    %c0_2 = arith.constant 0 : index
    %c0_3 = arith.constant 0 : index
    %4 = vector.load %arg3[%c0_2, %c0_3] : memref<32x64xf32, #tpu.memory_space<vmem>>, vector<32x64xf32>
    %cst = arith.constant dense<0.000000e+00> : vector<16x64xf32>
    %5 = tpu.matmul %3, %4, %cst {dimension_numbers = #tpu.dot_dimension_numbers<[1], [0], [0], [1], [0, 0, 1, 1], [], []>} : vector<16x32xf32>, vector<32x64xf32>, vector<16x64xf32> -> vector<16x64xf32>
    %c0_4 = arith.constant 0 : index
    %c0_5 = arith.constant 0 : index
    %6 = vector.load %arg4[%c0_4, %c0_5] : memref<1x64xf32, #tpu.memory_space<vmem>>, vector<1x64xf32>
    %7 = vector.broadcast %6 : vector<1x64xf32> to vector<16x64xf32>
    %8 = arith.addf %5, %7 : vector<16x64xf32>
    %cst_6 = arith.constant 5.000000e-01 : f32
    %9 = vector.broadcast %cst_6 : f32 to vector<16x64xf32>
    %10 = arith.mulf %9, %8 : vector<16x64xf32>
    %cst_7 = arith.constant 0.707106769 : f32
    %11 = vector.broadcast %cst_7 : f32 to vector<16x64xf32>
    %12 = arith.mulf %8, %11 : vector<16x64xf32>
    %13 = math.erf %12 : vector<16x64xf32>
    %cst_8 = arith.constant 1.000000e+00 : f32
    %14 = vector.broadcast %cst_8 : f32 to vector<16x64xf32>
    %15 = arith.addf %14, %13 : vector<16x64xf32>
    %16 = arith.mulf %10, %15 : vector<16x64xf32>
    %c0_9 = arith.constant 0 : index
    %c0_10 = arith.constant 0 : index
    %17 = vector.load %arg8[%c0_9, %c0_10] : memref<16x32xf32, #tpu.memory_space<vmem>>, vector<16x32xf32>
    %c0_11 = arith.constant 0 : index
    %c0_12 = arith.constant 0 : index
    %18 = vector.load %arg5[%c0_11, %c0_12] : memref<64x32xf32, #tpu.memory_space<vmem>>, vector<64x32xf32>
    %cst_13 = arith.constant dense<0.000000e+00> : vector<16x32xf32>
    %19 = tpu.matmul %16, %18, %cst_13 {dimension_numbers = #tpu.dot_dimension_numbers<[1], [0], [0], [1], [0, 0, 1, 1], [], []>} : vector<16x64xf32>, vector<64x32xf32>, vector<16x32xf32> -> vector<16x32xf32>
    %20 = arith.addf %17, %19 : vector<16x32xf32>
    %c0_14 = arith.constant 0 : index
    %c0_15 = arith.constant 0 : index
    %21 = vector.load %arg8[%c0_14, %c0_15] : memref<16x32xf32, #tpu.memory_space<vmem>>, vector<16x32xf32>
    tpu.vector_store %arg8[%c0_14, %c0_15], %20 {strides = array<i32>} : memref<16x32xf32, #tpu.memory_space<vmem>>, vector<16x32xf32>,
    %c0_i32_16 = arith.constant 0 : i32
    %22 = arith.cmpi eq, %arg1, %c0_i32_16 : i32
    %23 = arith.extui %22 : i1 to i32
    %c0_i32_17 = arith.constant 0 : i32
    %24 = arith.cmpi ne, %23, %c0_i32_17 : i32
    scf.if %24 {
      %c0_18 = arith.constant 0 : index
      %c0_19 = arith.constant 0 : index
      %25 = vector.load %arg8[%c0_18, %c0_19] : memref<16x32xf32, #tpu.memory_space<vmem>>, vector<16x32xf32>
      %c0_20 = arith.constant 0 : index
      %c0_21 = arith.constant 0 : index
      %26 = vector.load %arg6[%c0_20, %c0_21] : memref<1x32xf32, #tpu.memory_space<vmem>>, vector<1x32xf32>
      %27 = vector.broadcast %26 : vector<1x32xf32> to vector<16x32xf32>
      %28 = arith.addf %25, %27 : vector<16x32xf32>
      %c0_22 = arith.constant 0 : index
      %c0_23 = arith.constant 0 : index
      %29 = vector.load %arg7[%c0_22, %c0_23] : memref<16x32xf32, #tpu.memory_space<vmem>>, vector<16x32xf32>
      tpu.vector_store %arg7[%c0_22, %c0_23], %28 {strides = array<i32>} : memref<16x32xf32, #tpu.memory_space<vmem>>, vector<16x32xf32>,
    } else {
    }
    return
  }
  func.func @transform_0(%arg0: i32, %arg1: i32) -> (i32, i32) {
    %c0_i32 = arith.constant 0 : i32
    %c0_i32_0 = arith.constant 0 : i32
    return %arg0, %c0_i32 : i32, i32
  }
  func.func @transform_1(%arg0: i32, %arg1: i32) -> (i32, i32) {
    %c0_i32 = arith.constant 0 : i32
    %c0_i32_0 = arith.constant 0 : i32
    return %c0_i32, %arg1 : i32, i32
  }
  func.func @transform_2(%arg0: i32, %arg1: i32) -> (i32, i32) {
    %c0_i32 = arith.constant 0 : i32
    %c0_i32_0 = arith.constant 0 : i32
    return %c0_i32, %arg1 : i32, i32
  }
  func.func @transform_3(%arg0: i32, %arg1: i32) -> (i32, i32) {
    %c0_i32 = arith.constant 0 : i32
    %c0_i32_0 = arith.constant 0 : i32
    return %arg1, %c0_i32 : i32, i32
  }
  func.func @transform_4(%arg0: i32, %arg1: i32) -> (i32, i32) {
    %c0_i32 = arith.constant 0 : i32
    %c0_i32_0 = arith.constant 0 : i32
    %c0_i32_1 = arith.constant 0 : i32
    return %c0_i32, %c0_i32_0 : i32, i32
  }
  func.func @transform_5(%arg0: i32, %arg1: i32) -> (i32, i32) {
    %c0_i32 = arith.constant 0 : i32
    %c0_i32_0 = arith.constant 0 : i32
    return %arg0, %c0_i32 : i32, i32
  }
}

</mosaic_0001>

<bundles_post_ra>
// kernel: tpu_custom_call.1
= control target key start
LH: loop header
LB: loop body
LE: loop exit
PB: predicated region body
PF: predicated region fallthrough
CT: control target
= control target key end

     0   :  { %vm25_vm0 = vcmask 261120   ;;  %s471_s0 = inlined_call_operand.vmem [shape: f32[16,32], index: 0, kind: input, shape index: {}]   ;;  %s472_s1 = inlined_call_operand.vmem [shape: f32[32,64], index: 1, kind: input, shape index: {}]   ;;  %s473_s2 = inlined_call_operand.vmem [shape: f32[1,64], index: 2, kind: input, shape index: {}]   ;;  %s474_s3 = inlined_call_operand.vmem [shape: f32[64,32], index: 3, kind: input, shape index: {}]   ;;  %s475_s4 = inlined_call_operand.vmem [shape: f32[1,32], index: 4, kind: input, shape index: {}]   ;;  %s476_s5 = inlined_call_operand.hbm [shape: f32[16,32], index: 5, kind: output, shape index: {}]  }
   0x1   :  { %v30_v0 = vld [vmem:[%s472_s1] sm:$0xff]  ;;  %v31_v1 = vld [vmem:[%s472_s1 + $0x8] sm:$0xff]  ;;  %v32_v2 = vld [vmem:[%s472_s1 + $0x10] sm:$0xff] }
   0x2   :  { %v313_v3 = vpack.c.bf16 %v31_v1, %v30_v0  ;;  %v33_v4 = vld [vmem:[%s472_s1 + $0x18] sm:$0xff]  ;;  %v28_v5 = vld [vmem:[%s471_s0] sm:$0xff] }
   0x3   :  { %v317_v6 = vpack.c.bf16 %v33_v4, %v32_v2  ;;  %291 = vmatprep.mubr.msk.f32.mxu0 %vm25_vm0, %v28_v5 }
   0x4   :  { %10 = vsyncpa [#allocation4], 0  ;;  %314 = vmatprep.subr.bf16.mxu0 %v313_v3  ;;  %v29_v7 = vld [vmem:[%s471_s0 + $0x8] sm:$0xff]  ;;  %v135_v8 = vld [vmem:[%s474_s3] sm:$0xff]  ;;  %v369_v20 = vmov 0.0   ;;  %vm143_vm1 = vcmask 523264  }
   0x5   :  { %316 = vmatpush3.bf16.msra.mxu0 %v313_v3  ;;  %v136_v9 = vld [vmem:[%s474_s3 + $0x8] sm:$0xff]  ;;  %v137_v11 = vld [vmem:[%s474_s3 + $0x10] sm:$0xff]  ;;  %v138_v12 = vld [vmem:[%s474_s3 + $0x18] sm:$0xff]  ;;  %27 = vst.msk [vmem:[#allocation2 + $0x8] sm:$0xff] %vm25_vm0, %v369_v20  ;;  %s370_s21 = smov [#allocation3]  }
   0x6   :  { %318 = vmatprep.subr.bf16.mxu0 %v317_v6  ;;  %v321_v10 = vpack.c.bf16 %v136_v9, %v135_v8  ;;  %v325_v13 = vpack.c.bf16 %v138_v12, %v137_v11  ;;  %v139_v14 = vld [vmem:[%s474_s3 + $0x20] sm:$0xff]  ;;  %v140_v15 = vld [vmem:[%s474_s3 + $0x28] sm:$0xff]  ;;  %v141_v17 = vld [vmem:[%s474_s3 + $0x30] sm:$0xff]  ;;  %26 = vst.msk [vmem:[#allocation2] sm:$0xff] %vm25_vm0, %v369_v20  ;;  %s250_s22 = sshll.u32 %s370_s21, 4  ;;  %s251_s22 = int_to_ptr.vmem [resolvable:$true] %s250_s22 }
   0x7   :  { %v329_v16 = vpack.c.bf16 %v140_v15, %v139_v14  ;;  %v142_v18 = vld [vmem:[%s474_s3 + $0x38] sm:$0xff]  ;;  %v261_v21 = vld [vmem:[%s473_s2] ss:$0 sm:$0xff]  ;;  %s345_s23 = scalar_lea.vmem %s251_s22, 256  ;;  %p350_p1 = scmp.lt.s32.totalorder %s251_s22, %s251_s22 }
   0x8   :  { %322 = vmatprep.subr.bf16.mxu1 %v321_v10  ;;  %v333_v19 = vpack.c.bf16 %v142_v18, %v141_v17  ;;  %v266_v42 = vld [vmem:[%s475_s4] ss:$0 sm:$0xff]  ;;  %p346_p0 = scmp.ne.s32.totalorder %s251_s22, %s345_s23  ;;  %p351_p2 = scmp.lt.s32.totalorder %s345_s23, %s345_s23 }
   0x9   :  { %320 = vmatpush3.bf16.msra.mxu0 %v317_v6  ;;  %324 = vmatpush3.bf16.msra.mxu1 %v321_v10 }
   0xa   :  { %326 = vmatprep.subr.bf16.mxu1 %v325_v13  ;;  %p352_p3 = por %p351_p2, %p350_p1 }
   0xc   :  { %292 = vmatmul.mubr.msk.f32.vlgmr.msra.gmra.mrb[0].mxu0 %vm25_vm0, %v29_v7  ;;  %v134_v36 = vld [vmem:[#allocation2 + $0x8] sm:$0xff]  ;;  %p353_p4 = pnand %p352_p3, %p346_p0 }
   0xd   :  { %328 = vmatpush3.bf16.msra.mxu1 %v325_v13  ;;  %v133_v37 = vld [vmem:[#allocation2] sm:$0xff] }
   0xe   :  { %330 = vmatprep.subr.bf16.mxu1 %v329_v16 }
  0x11   :  { %332 = vmatpush3.bf16.msra.mxu1 %v329_v16 }
  0x12   :  { %334 = vmatprep.subr.bf16.mxu1 %v333_v19 }
  0x15   :  { %336 = vmatpush3.bf16.msra.mxu1 %v333_v19 }
  0xdf   :  { %v293_v22 = vpop.f32.mrb[0].mxu0 }
  0xe0   :  { %v120_v23 = vadd.f32 %v293_v22, %v261_v21  ;;  %v114_v24 = vpop.f32.mrb[1].mxu0 }
  0xe1   :  { %v115_v25 = vadd.f32 %v261_v21, %v114_v24 }
  0xe2   :  { %v126_v26 = vmul.f32 0.70710677, %v120_v23  ;;  %v124_v33 = vmul.f32 0.5, %v120_v23 }
  0xe3   :  { %v125_v27 = vmul.f32 0.70710677, %v115_v25  ;;  %v123_v31 = vmul.f32 0.5, %v115_v25 }
  0xe4   :  { %341 = verf.f32 %v126_v26 }
  0xe5   :  { %343 = verf.f32 %v125_v27 }
  0xee   :  { %v342_v28 = vpop.eup %341 }
  0xef   :  { %v344_v29 = vpop.eup %343  ;;  %v130_v30 = vadd.f32 1.0, %v342_v28 }
  0xf0   :  { %v129_v32 = vadd.f32 1.0, %v344_v29 }
  0xf1   :  { %v132_v35 = vmul.f32 %v130_v30, %v124_v33 }
  0xf2   :  { %v131_v34 = vmul.f32 %v129_v32, %v123_v31 }
  0xf4   :  { %310 = vmatprep.mubr.msk.f32.mxu1 %vm143_vm1, %v131_v34 }
  0xf5   :  { %311 = vmatmul.mubr.msk.f32.vlgmr.msra.gmra.mrb[0].mxu1 %vm143_vm1, %v132_v35 }
 0x1c8   :  { %v312_v38 = vpop.f32.mrb[0].mxu1 }
 0x1c9   :  { %v226_v39 = vadd.f32 %v312_v38, %v134_v36  ;;  %v216_v40 = vpop.f32.mrb[1].mxu1 }
 0x1ca   :  { %v225_v41 = vadd.f32 %v216_v40, %v133_v37 }
 0x1cb   :  { %228 = vst.msk [vmem:[#allocation2 + $0x8] sm:$0xff] %vm25_vm0, %v226_v39 }
 0x1cc   :  { %227 = vst.msk [vmem:[#allocation2] sm:$0xff] %vm25_vm0, %v225_v41 }
 0x1d2   :  { %v233_v43 = vld [vmem:[#allocation2 + $0x8] sm:$0xff] }
 0x1d3   :  { %v232_v44 = vld [vmem:[#allocation2] sm:$0xff]  ;;  %v242_v45 = vadd.f32 %v266_v42, %v233_v43 }
 0x1d4   :  { %v241_v46 = vadd.f32 %v266_v42, %v232_v44 }
 0x1d5   :  { %244 = vst.msk [vmem:[#allocation3 + $0x8] sm:$0xff] %vm25_vm0, %v242_v45 }
 0x1d6   :  { %243 = vst.msk [vmem:[#allocation3] sm:$0xff] %vm25_vm0, %v241_v46 }
 0x1d7   :  { %356 = shalt.err (!%p353_p4)
}
 0x1d8   :  { %s357_s25 = scalar_lea.hbm %s476_s5, 256 }
 0x1d9   :  { %p358_p5 = scmp.ne.s32.totalorder %s476_s5, %s357_s25  ;;  %p361_p6 = scmp.lt.u32.totalorder %s357_s25, %s476_s5 }
 0x1db   :  { %p363_p7 = pnand %p361_p6, %p358_p5 }
 0x1dd   :  { %366 = shalt.err (!%p363_p7)
}
 0x1de   :  { %s371_s30 = smov 128   ;;  %s372_s1 = smov 8  }
 0x1df   :  { %256 = dma.vmem_to_hbm [thread:$0]  %s251_s22, 256, %s476_s5, [#allocation4], %s371_s30, %s371_s30, %s372_s1  }
 0x1e0   :  { %367 = dma.done.wait [#allocation4], 256  }
 0x1e1   :  { %368 = vsyncadd [#allocation4], 4294967040 }
 0x1e2   :  { %260 = vsyncpa [#allocation4], 1 }

</bundles_post_ra>
